<compile_context>
chip_gen: v6e
topology: v6e:2x2x1
jax: 0.10.0
libtpu: 0.0.40
codegen_flags: <defaults>
</compile_context>

<pallas_src>
import jax
import jax.numpy as jnp
from jax.experimental import pallas as pl
from jax.experimental.pallas import tpu as pltpu


def _tokenize_kernel(x_ref, o_ref):
    # x_ref: (C, T_HW) VMEM tile; o_ref: (T_HW, C) VMEM tile.
    # forward == identity, so tokenize reduces to a last-two-axis transpose
    # (XLU vxpose). The kernel is purely memory-bound; the tiling above is
    # what matters for hitting the HBM roofline.
    o_ref[...] = x_ref[...].T


def _pick_tile_hw(c, hw, dtype_bytes, vmem_budget_bytes=20 << 20):
    """Largest legal HW tile whose double-buffered in+out tiles fit the budget.

    Per grid step VMEM = 2 (double buffer) * (C*T + T*C) * bytes = 4*C*T*bytes.
    T must be a multiple of 128 (input lane dim / output sublane dim) unless it
    equals the full HW extent (then the (8,128) rule is trivially satisfied).
    """
    t = vmem_budget_bytes // (4 * c * dtype_bytes)
    if t >= hw:
        return hw                      # full extent: always layout-legal
    t = (t // 128) * 128               # lane/sublane alignment once tiled
    return max(t, 128)


def _tokenize_pallas(x_flat):
    """x_flat: (N, C, HW) with C >= 128 -> (N, HW, C) via a tiled transpose."""
    n, c, hw = x_flat.shape
    dtype_bytes = jnp.dtype(x_flat.dtype).itemsize
    t_hw = _pick_tile_hw(c, hw, dtype_bytes)
    grid = (n, pl.cdiv(hw, t_hw))      # partial last HW tile is masked by Pallas

    return pl.pallas_call(
        _tokenize_kernel,
        out_shape=jax.ShapeDtypeStruct((n, hw, c), x_flat.dtype),
        grid=grid,
        in_specs=[
            pl.BlockSpec((pl.Squeezed(), c, t_hw), lambda b, t: (b, 0, t)),
        ],
        out_specs=pl.BlockSpec((pl.Squeezed(), t_hw, c), lambda b, t: (b, t, 0)),
        compiler_params=pltpu.CompilerParams(
            # Both axes independent -> megacore / dual-TC sharding on v7x.
            dimension_semantics=("parallel", "parallel"),
            # Raise above v5e's 16 MiB scoped default; <= v7x's 32 MiB default
            # and well under every chip's physical VMEM.
            vmem_limit_bytes=32 << 20,
        ),
    )(x_flat)


def forward(x):
    """Concrete realization of the abstract BaseModel.forward: identity."""
    return x


def tokenize(x, *, min_pallas_c=128):
    """x: (N, C, H, W) -> (N, H*W, C), matching
    BaseModel.tokenize = forward(x).flatten(2).permute(0, 2, 1)."""
    y = forward(x)
    n, c, h, w = y.shape
    hw = h * w
    y_flat = y.reshape(n, c, hw)       # glue: flatten(2)
    if c < min_pallas_c:
        # Small channel count: the output lane dim (C) would use C/128 lanes
        # per store; let XLA do the permute (and fuse it into the consumer).
        return jnp.swapaxes(y_flat, 1, 2)
    return _tokenize_pallas(y_flat)


if __name__ == "__main__":
    key = jax.random.PRNGKey(0)

    # Lane-dense case (C >= 128): exercises the Pallas kernel.
    N, C, H, W = 2, 128, 16, 16
    x = jax.random.normal(key, (N, C, H, W), dtype=jnp.float32)
    y = jax.block_until_ready(tokenize(x))
    y_ref = jnp.swapaxes(x.reshape(N, C, H * W), 1, 2)
    assert y.shape == (N, H * W, C), y.shape
    assert y.dtype == x.dtype
    assert jnp.array_equal(y, y_ref), "pallas path mismatch vs reference"

    # Small-C case (C < 128): wrapper bypasses Pallas by design.
    xs = jax.random.normal(jax.random.PRNGKey(0), (2, 4, 16, 16),
                           dtype=jnp.float32)
    ys = jax.block_until_ready(tokenize(xs))
    ys_ref = jnp.swapaxes(xs.reshape(2, 4, 16 * 16), 1, 2)
    assert ys.shape == (2, 16 * 16, 4), ys.shape
    assert jnp.array_equal(ys, ys_ref), "fallback path mismatch vs reference"

    print("KERNEL_OK")
</pallas_src>

<mosaic_0001>
module attributes {stable_mosaic.version = 11 : i64} {
  func.func @_tokenize_kernel(%arg0: i32, %arg1: i32, %arg2: memref<1x128x256xf32, #tpu.memory_space<vmem>>, %arg3: memref<1x256x128xf32, #tpu.memory_space<vmem>>) attributes {dimension_semantics = [#tpu.dimension_semantics<parallel>, #tpu.dimension_semantics<parallel>], iteration_bounds = array<i64: 2, 1>, scalar_prefetch = 0 : i64, scratch_operands = 0 : i64, tpu.core_type = #tpu.core_type<tc>, window_params = [{transform_indices = @transform_0, window_bounds = array<i64: 1, 128, 256>}, {transform_indices = @transform_1, window_bounds = array<i64: 1, 256, 128>}]} {
    %c0 = arith.constant 0 : index
    %c0_0 = arith.constant 0 : index
    %c0_1 = arith.constant 0 : index
    %0 = vector.load %arg2[%c0, %c0_0, %c0_1] : memref<1x128x256xf32, #tpu.memory_space<vmem>>, vector<1x128x256xf32>
    %1 = vector.shape_cast %0 : vector<1x128x256xf32> to vector<128x256xf32>
    %2 = tpu.transpose %1, [1, 0] : vector<128x256xf32> -> vector<256x128xf32>
    %c0_2 = arith.constant 0 : index
    %c0_3 = arith.constant 0 : index
    %c0_4 = arith.constant 0 : index
    %3 = vector.load %arg3[%c0_2, %c0_3, %c0_4] : memref<1x256x128xf32, #tpu.memory_space<vmem>>, vector<1x256x128xf32>
    %4 = vector.shape_cast %3 : vector<1x256x128xf32> to vector<256x128xf32>
    %5 = vector.shape_cast %2 : vector<256x128xf32> to vector<1x256x128xf32>
    tpu.vector_store %arg3[%c0_2, %c0_3, %c0_4], %5 {strides = array<i32>} : memref<1x256x128xf32, #tpu.memory_space<vmem>>, vector<1x256x128xf32>,
    return
  }
  func.func @transform_0(%arg0: i32, %arg1: i32) -> (i32, i32, i32) {
    %c0_i32 = arith.constant 0 : i32
    %c0_i32_0 = arith.constant 0 : i32
    return %arg0, %c0_i32, %arg1 : i32, i32, i32
  }
  func.func @transform_1(%arg0: i32, %arg1: i32) -> (i32, i32, i32) {
    %c0_i32 = arith.constant 0 : i32
    %c0_i32_0 = arith.constant 0 : i32
    return %arg0, %arg1, %c0_i32 : i32, i32, i32
  }
}

</mosaic_0001>

<bundles_post_ra>
// kernel: tpu_custom_call.1
= control target key start
LH: loop header
LB: loop body
LE: loop exit
PB: predicated region body
PF: predicated region fallthrough
CT: control target
= control target key end

     0   :  { %6 = vsyncpa [#allocation3], 0  ;;  %s814_s0 = inlined_call_operand.hbm [shape: f32[2,128,256], index: 0, kind: input, shape index: {}]   ;;  %s815_s1 = inlined_call_operand.hbm [shape: f32[2,256,128], index: 1, kind: output, shape index: {}]  }
   0x1   :  { %8 = vsyncpa [#allocation3 + $0x1], 0 }
   0x2   :  { %9 = vsyncpa [#allocation4], 0 }
   0x3   :  { %11 = vsyncpa [#allocation4 + $0x1], 0  ;;  %s595_s6 = smov 0   ;;  %s597_s7 = smov 0  }
   0x4   :  { %s599_s8 = smov 0   ;;  %s601_s9 = smov 0  }
   0x5   :  { %s603_s10 = smov 0   ;;  %s605_s11 = smov 0  }
   0x6 LB: > { %s386_s12 = sadd.s32 4294967295, %s577_s11   ;;  %s387_s13 = sadd.s32 4294967294, %s577_s11   ;;  %s577_s11 = sphi %s605_s11, %s17_s11   ;;  %s573_s10 = sphi %s603_s10, %s826_s10   ;;  %s569_s9 = sphi %s601_s9, %s825_s9   ;;  %s565_s8 = sphi %s599_s8, %s824_s8   ;;  %s561_s7 = sphi %s597_s7, %s823_s7   ;;  %s557_s6 = sphi %s595_s6, %s822_s6  }
   0x7   : > { %s29_s14 = sadd.s32 1, %s573_s10  ;;  %s38_s15 = sadd.s32 1, %s565_s8 }
   0x8   : > { %p31_p0 = scmp.ge.s32.totalorder %s29_s14, 2  ;;  %p45_p1 = scmp.ne.s32.totalorder %s565_s8, %s561_s7 }
   0x9   : > { %p46_p2 = scmp.eq.s32.totalorder %s577_s11, 0  ;;  %p51_p3 = scmp.ne.s32.totalorder %s561_s7, %s557_s6 }
   0xa   : > { %s828_s14 = smov (%p31_p0, %s29_s14), 0  ;;  %p52_p5 = scmp.eq.s32.totalorder %s386_s12, 0 }
   0xb   : > { %p636_p4 = por %p46_p2, %p45_p1  ;;  %s33_s17 = ssub.s32 %s573_s10, %s828_s14 }
   0xc   : > { %p77_p6 = scmp.eq.s32.totalorder %s386_s12, 1  ;;  %p36_p7 = scmp.eq.s32.totalorder %s33_s17, 0 }
   0xd   : > { %p642_p8 = por %p52_p5, %p51_p3  ;;  %p83_p10 = scmp.eq.s32.totalorder %s387_s13, 1 }
   0xe   : > { %p646_p9 = por %p77_p6, %p45_p1  ;;  %p415_p13 = scmp.lt.s32.totalorder %s577_s11, 2 }
   0xf   : > { %s651_s20 = scalar_select %p36_p7, %s565_s8, %s38_s15  }
  0x10   : > { %p653_p11 = por %p83_p10, %p51_p3  ;;  %s103_s22 = sand.u32 1, %s565_s8  }
  0x11   : > { %s390_s23 = sshll.u32 %s103_s22, 8  ;;  %s401_s24 = sshll.u32 %s573_s10, 12 }
  0x12   : > { %s115_s27 = scalar_lea.hbm %s814_s0, %s401_s24  ;;  %s107_s28 = scalar_lea.vmem [#allocation2], %s390_s23 }
  0x13   : > { %s116_s29 = sshll.u32 %s107_s28, 4  ;;  %p666_p0 = pnand %p415_p13, %p636_p4  ;;  %s117_s29 = int_to_ptr.vmem [resolvable:$true] %s116_s29 }
  0x14   : > { %p393_p1 = scmp.ge.s32.totalorder %s577_s11, 1  ;;  %s104_s2 = scalar_lea.sflag [#allocation3], %s103_s22 }
  0x15   : > { %p471_p2 = pneg %p666_p0  ;;  %s482_s3 = scalar_lea.vmem %s117_s29, 4096 }
  0x16   : > { %p483_p3 = scmp.ne.s32.totalorder %s117_s29, %s482_s3  ;;  %s579_s4 = smov [#allocation2]  }
  0x17   : > { %s487_s5 = sshll.u32 %s579_s4, 4  ;;  %s488_s5 = int_to_ptr.vmem [resolvable:$false] %s487_s5 }
  0x18   : > { %p485_p5 = pnand %p483_p3, %p471_p2  ;;  %s489_s12 = scalar_lea.vmem %s488_s5, 8192 }
  0x19   : > { %p490_p7 = scmp.lt.s32.totalorder %s117_s29, %s488_s5  ;;  %p491_p10 = scmp.lt.s32.totalorder %s489_s12, %s482_s3 }
  0x1a   : > { %p486_p6 = pneg %p485_p5 }
  0x1b   : > { %p492_p12 = por %p491_p10, %p490_p7 }
  0x1d   : > { %p493_p4 = pnand %p492_p12, %p486_p6 }
  0x1f   : > { %496 = shalt.err (!%p493_p4)
}
  0x20   : > { %s580_s13 = smov 256   ;;  %s581_s15 = smov 16  }
  0x21   : > { %410 = dma.hbm_to_vmem [thread:$0]  (!%p666_p0), %s115_s27, 4096, %s117_s29, %s104_s2, %s580_s13, %s580_s13, %s581_s15  }
  0x22   : > { %p124_p13 = scmp.lt.s32.totalorder %s577_s11, 3 }
  0x24   : > { %p125_p2 = pnand %p393_p1, %p124_p13 }
  0x25   : > { %s679_s16 = sand.u32 (!%p125_p2), 1, %s561_s7  }
  0x26   : > { %128 = sbr.rel (%p125_p2) target bundleno = 244 (0xf4), region = 24  ;;  %s394_s17 = sshll.u32 (!%p125_p2), %s679_s16, 8 }
  0x27   : > { %s131_s22 = scalar_lea.sflag (!%p125_p2), [#allocation3], %s679_s16  ;;  %s685_s23 = scalar_lea.vmem (!%p125_p2), [#allocation2], %s394_s17 }
  0x2b   : > { %548 = dma.done.wait (%p642_p8), %s131_s22, 4096  }
  0x2c   : > { %550 = vsyncadd (%p642_p8), %s131_s22, 4294963200  ;;  %v156_v0 = vld [vmem:[%s685_s23 + $0x8] sm:$0xff]  ;;  %v155_v1 = vld [vmem:[%s685_s23] sm:$0xff]  ;;  %s725_s18 = scalar_lea.vmem [#allocation5], %s394_s17  ;;  %s402_s24 = sshll.u32 %s569_s9, 12 }
  0x2d   : > { %219 = vxpose.xlu1.b32.start [1/16] %v156_v0, 128  ;;  %187 = vxpose.xlu0.b32.start [1/16] %v155_v1, 128  ;;  %v158_v2 = vld [vmem:[%s685_s23 + $0x18] sm:$0xff]  ;;  %v157_v3 = vld [vmem:[%s685_s23 + $0x10] sm:$0xff]  ;;  %v160_v4 = vld [vmem:[%s685_s23 + $0x28] sm:$0xff]  ;;  %s299_s25 = sshll.u32 %s725_s18, 4  ;;  %s762_s28 = scalar_lea.hbm %s815_s1, %s402_s24  ;;  %s764_s25 = int_to_ptr.vmem [resolvable:$true] %s299_s25 }
  0x2e   : > { %v159_v5 = vld [vmem:[%s685_s23 + $0x20] sm:$0xff]  ;;  %v162_v6 = vld [vmem:[%s685_s23 + $0x38] sm:$0xff]  ;;  %v161_v7 = vld [vmem:[%s685_s23 + $0x30] sm:$0xff]  ;;  %s284_s9 = scalar_lea.sflag [#allocation4], %s679_s16  ;;  %s497_s29 = scalar_lea.vmem %s764_s25, 4096 }
  0x2f   : > { %v164_v8 = vld [vmem:[%s685_s23 + $0x48] sm:$0xff]  ;;  %v163_v9 = vld [vmem:[%s685_s23 + $0x40] sm:$0xff]  ;;  %v166_v10 = vld [vmem:[%s685_s23 + $0x58] sm:$0xff]  ;;  %p498_p8 = scmp.ne.s32.totalorder %s764_s25, %s497_s29  ;;  %s582_s30 = smov [#allocation5]  }
  0x30   : > { %v165_v11 = vld [vmem:[%s685_s23 + $0x50] sm:$0xff]  ;;  %v168_v12 = vld [vmem:[%s685_s23 + $0x68] sm:$0xff]  ;;  %v167_v13 = vld [vmem:[%s685_s23 + $0x60] sm:$0xff]  ;;  %s501_s2 = sshll.u32 %s582_s30, 4  ;;  %s502_s2 = int_to_ptr.vmem [resolvable:$false] %s501_s2 }
  0x31   : > { %220 = vxpose.xlu1.b32.cont [2/16] %v158_v2, 128  ;;  %188 = vxpose.xlu0.b32.cont [2/16] %v157_v3, 128  ;;  %v170_v14 = vld [vmem:[%s685_s23 + $0x78] sm:$0xff]  ;;  %v169_v15 = vld [vmem:[%s685_s23 + $0x70] sm:$0xff]  ;;  %v172_v16 = vld [vmem:[%s685_s23 + $0x88] sm:$0xff]  ;;  %p499_p12 = pnand %p498_p8, %p646_p9  ;;  %s503_s3 = scalar_lea.vmem %s502_s2, 8192 }
  0x32   : > { %v171_v17 = vld [vmem:[%s685_s23 + $0x80] sm:$0xff]  ;;  %v174_v18 = vld [vmem:[%s685_s23 + $0x98] sm:$0xff]  ;;  %v173_v19 = vld [vmem:[%s685_s23 + $0x90] sm:$0xff]  ;;  %p504_p1 = scmp.lt.s32.totalorder %s764_s25, %s502_s2  ;;  %p505_p3 = scmp.lt.s32.totalorder %s503_s3, %s497_s29 }
  0x33   : > { %v176_v20 = vld [vmem:[%s685_s23 + $0xa8] sm:$0xff]  ;;  %v175_v21 = vld [vmem:[%s685_s23 + $0xa0] sm:$0xff]  ;;  %v178_v22 = vld [vmem:[%s685_s23 + $0xb8] sm:$0xff]  ;;  %p500_p0 = pneg %p499_p12 }
  0x34   : > { %v177_v23 = vld [vmem:[%s685_s23 + $0xb0] sm:$0xff]  ;;  %v180_v24 = vld [vmem:[%s685_s23 + $0xc8] sm:$0xff]  ;;  %v179_v25 = vld [vmem:[%s685_s23 + $0xc0] sm:$0xff]  ;;  %p506_p5 = por %p505_p3, %p504_p1 }
  0x35   : > { %221 = vxpose.xlu1.b32.cont [3/16] %v160_v4, 128  ;;  %189 = vxpose.xlu0.b32.cont [3/16] %v159_v5, 128  ;;  %v182_v26 = vld [vmem:[%s685_s23 + $0xd8] sm:$0xff]  ;;  %v181_v27 = vld [vmem:[%s685_s23 + $0xd0] sm:$0xff]  ;;  %v184_v28 = vld [vmem:[%s685_s23 + $0xe8] sm:$0xff] }
  0x36   : > { %v183_v29 = vld [vmem:[%s685_s23 + $0xe0] sm:$0xff]  ;;  %v186_v30 = vld [vmem:[%s685_s23 + $0xf8] sm:$0xff]  ;;  %v185_v31 = vld [vmem:[%s685_s23 + $0xf0] sm:$0xff]  ;;  %p507_p6 = pnand %p506_p5, %p500_p0 }
  0x39   : > { %222 = vxpose.xlu1.b32.cont [4/16] %v162_v6, 128  ;;  %190 = vxpose.xlu0.b32.cont [4/16] %v161_v7, 128 }
  0x3d   : > { %223 = vxpose.xlu1.b32.cont [5/16] %v164_v8, 128  ;;  %191 = vxpose.xlu0.b32.cont [5/16] %v163_v9, 128 }
  0x41   : > { %224 = vxpose.xlu1.b32.cont [6/16] %v166_v10, 128  ;;  %192 = vxpose.xlu0.b32.cont [6/16] %v165_v11, 128 }
  0x45   : > { %225 = vxpose.xlu1.b32.cont [7/16] %v168_v12, 128  ;;  %193 = vxpose.xlu0.b32.cont [7/16] %v167_v13, 128 }
  0x49   : > { %226 = vxpose.xlu1.b32.cont [8/16] %v170_v14, 128  ;;  %194 = vxpose.xlu0.b32.cont [8/16] %v169_v15, 128 }
  0x4d   : > { %227 = vxpose.xlu1.b32.cont [9/16] %v172_v16, 128  ;;  %195 = vxpose.xlu0.b32.cont [9/16] %v171_v17, 128 }
  0x51   : > { %228 = vxpose.xlu1.b32.cont [10/16] %v174_v18, 128  ;;  %196 = vxpose.xlu0.b32.cont [10/16] %v173_v19, 128 }
  0x55   : > { %229 = vxpose.xlu1.b32.cont [11/16] %v176_v20, 128  ;;  %197 = vxpose.xlu0.b32.cont [11/16] %v175_v21, 128 }
  0x59   : > { %230 = vxpose.xlu1.b32.cont [12/16] %v178_v22, 128  ;;  %198 = vxpose.xlu0.b32.cont [12/16] %v177_v23, 128 }
  0x5d   : > { %231 = vxpose.xlu1.b32.cont [13/16] %v180_v24, 128  ;;  %199 = vxpose.xlu0.b32.cont [13/16] %v179_v25, 128 }
  0x61   : > { %232 = vxpose.xlu1.b32.cont [14/16] %v182_v26, 128  ;;  %200 = vxpose.xlu0.b32.cont [14/16] %v181_v27, 128 }
  0x65   : > { %233 = vxpose.xlu1.b32.cont [15/16] %v184_v28, 128  ;;  %201 = vxpose.xlu0.b32.cont [15/16] %v183_v29, 128 }
  0x69   : > { %234 = vxpose.xlu1.b32.end [16/16] %v186_v30, 128  ;;  %202 = vxpose.xlu0.b32.end [16/16] %v185_v31, 128 }
  0xa9   : > { %v235_v32 = vpop.trf.xlu1  ;;  %v203_v33 = vpop.trf.xlu0 }
  0xaa   : > { %267 = vst [vmem:[%s725_s18 + $0x80] sm:$0xff] %v235_v32  ;;  %251 = vst [vmem:[%s725_s18] sm:$0xff] %v203_v33 }
  0xad   : > { %v236_v34 = vpop.trf.xlu1  ;;  %v204_v35 = vpop.trf.xlu0 }
  0xae   : > { %268 = vst [vmem:[%s725_s18 + $0x88] sm:$0xff] %v236_v34  ;;  %252 = vst [vmem:[%s725_s18 + $0x8] sm:$0xff] %v204_v35 }
  0xb1   : > { %v237_v36 = vpop.trf.xlu1  ;;  %v205_v37 = vpop.trf.xlu0 }
  0xb2   : > { %269 = vst [vmem:[%s725_s18 + $0x90] sm:$0xff] %v237_v36  ;;  %253 = vst [vmem:[%s725_s18 + $0x10] sm:$0xff] %v205_v37 }
  0xb5   : > { %v238_v38 = vpop.trf.xlu1  ;;  %v206_v39 = vpop.trf.xlu0 }
  0xb6   : > { %270 = vst [vmem:[%s725_s18 + $0x98] sm:$0xff] %v238_v38  ;;  %254 = vst [vmem:[%s725_s18 + $0x18] sm:$0xff] %v206_v39 }
  0xb9   : > { %v239_v40 = vpop.trf.xlu1  ;;  %v207_v41 = vpop.trf.xlu0 }
  0xba   : > { %271 = vst [vmem:[%s725_s18 + $0xa0] sm:$0xff] %v239_v40  ;;  %255 = vst [vmem:[%s725_s18 + $0x20] sm:$0xff] %v207_v41 }
  0xbd   : > { %v240_v42 = vpop.trf.xlu1  ;;  %v208_v43 = vpop.trf.xlu0 }
  0xbe   : > { %272 = vst [vmem:[%s725_s18 + $0xa8] sm:$0xff] %v240_v42  ;;  %256 = vst [vmem:[%s725_s18 + $0x28] sm:$0xff] %v208_v43 }
  0xc1   : > { %v241_v44 = vpop.trf.xlu1  ;;  %v209_v45 = vpop.trf.xlu0 }
  0xc2   : > { %273 = vst [vmem:[%s725_s18 + $0xb0] sm:$0xff] %v241_v44  ;;  %257 = vst [vmem:[%s725_s18 + $0x30] sm:$0xff] %v209_v45 }
  0xc5   : > { %v242_v46 = vpop.trf.xlu1  ;;  %v210_v47 = vpop.trf.xlu0 }
  0xc6   : > { %274 = vst [vmem:[%s725_s18 + $0xb8] sm:$0xff] %v242_v46  ;;  %258 = vst [vmem:[%s725_s18 + $0x38] sm:$0xff] %v210_v47 }
  0xc9   : > { %v243_v48 = vpop.trf.xlu1  ;;  %v211_v49 = vpop.trf.xlu0 }
  0xca   : > { %275 = vst [vmem:[%s725_s18 + $0xc0] sm:$0xff] %v243_v48  ;;  %259 = vst [vmem:[%s725_s18 + $0x40] sm:$0xff] %v211_v49 }
  0xcd   : > { %v244_v50 = vpop.trf.xlu1  ;;  %v212_v51 = vpop.trf.xlu0 }
  0xce   : > { %276 = vst [vmem:[%s725_s18 + $0xc8] sm:$0xff] %v244_v50  ;;  %260 = vst [vmem:[%s725_s18 + $0x48] sm:$0xff] %v212_v51 }
  0xd1   : > { %v245_v52 = vpop.trf.xlu1  ;;  %v213_v53 = vpop.trf.xlu0 }
  0xd2   : > { %277 = vst [vmem:[%s725_s18 + $0xd0] sm:$0xff] %v245_v52  ;;  %261 = vst [vmem:[%s725_s18 + $0x50] sm:$0xff] %v213_v53 }
  0xd5   : > { %v246_v54 = vpop.trf.xlu1  ;;  %v214_v55 = vpop.trf.xlu0 }
  0xd6   : > { %278 = vst [vmem:[%s725_s18 + $0xd8] sm:$0xff] %v246_v54  ;;  %262 = vst [vmem:[%s725_s18 + $0x58] sm:$0xff] %v214_v55 }
  0xd9   : > { %v247_v56 = vpop.trf.xlu1  ;;  %v215_v57 = vpop.trf.xlu0 }
  0xda   : > { %279 = vst [vmem:[%s725_s18 + $0xe0] sm:$0xff] %v247_v56  ;;  %263 = vst [vmem:[%s725_s18 + $0x60] sm:$0xff] %v215_v57 }
  0xdd   : > { %v248_v58 = vpop.trf.xlu1  ;;  %v216_v59 = vpop.trf.xlu0 }
  0xde   : > { %280 = vst [vmem:[%s725_s18 + $0xe8] sm:$0xff] %v248_v58  ;;  %264 = vst [vmem:[%s725_s18 + $0x68] sm:$0xff] %v216_v59 }
  0xe1   : > { %v249_v60 = vpop.trf.xlu1  ;;  %v217_v61 = vpop.trf.xlu0 }
  0xe2   : > { %281 = vst [vmem:[%s725_s18 + $0xf0] sm:$0xff] %v249_v60  ;;  %265 = vst [vmem:[%s725_s18 + $0x70] sm:$0xff] %v217_v61 }
  0xe5   : > { %v250_v62 = vpop.trf.xlu1  ;;  %v218_v63 = vpop.trf.xlu0 }
  0xe6   : > { %282 = vst [vmem:[%s725_s18 + $0xf8] sm:$0xff] %v250_v62  ;;  %266 = vst [vmem:[%s725_s18 + $0x78] sm:$0xff] %v218_v63 }
  0xe7   : > { %510 = shalt.err (!%p507_p6)
}
  0xe8   : > { %s511_s4 = scalar_lea.hbm %s762_s28, 4096  ;;  %s515_s13 = scalar_lea.hbm %s815_s1, 8192 }
  0xe9   : > { %p512_p7 = scmp.ne.s32.totalorder %s762_s28, %s511_s4  ;;  %p516_p13 = scmp.lt.s32.totalorder %s762_s28, %s815_s1 }
  0xea   : > { %p517_p2 = scmp.lt.s32.totalorder %s515_s13, %s511_s4 }
  0xeb   : > { %p513_p10 = pnand %p512_p7, %p646_p9 }
  0xec   : > { %p518_p8 = por %p517_p2, %p516_p13 }
  0xed   : > { %p514_p4 = pneg %p513_p10 }
  0xef   : > { %p519_p12 = pnand %p518_p8, %p514_p4 }
  0xf1   : > { %522 = shalt.err (!%p519_p12)
}
  0xf2   : > { %s583_s22 = smov 128   ;;  %s584_s23 = smov 8  }
  0xf3   : > { %405 = dma.vmem_to_hbm [thread:$0]  (%p646_p9), %s764_s25, 4096, %s762_s28, %s284_s9, %s583_s22, %s583_s22, %s584_s23  }
  0xf4 PF: > { %s314_s18 = sand.u32 1, %s557_s6   ;;  %p821_p0 = scmp.ge.s32.totalorder %s577_s11, 2 }
  0xf5   : > { %s315_s24 = scalar_lea.sflag [#allocation4], %s314_s18 }
  0xf6   : > { %p412_p1 = pnand %p821_p0, %p653_p11 }
  0xf8   : > { %p413_p3 = pneg %p412_p1 }
  0xfa   : > { %552 = dma.done.wait (%p413_p3), %s315_s24, 4096  }
  0xfb   : > { %554 = vsyncadd (%p413_p3), %s315_s24, 4294963200  ;;  %s17_s11 = sadd.s32 1, %s577_s11   ;;  %s822_s6 = smov %s561_s7 }
  0xfc   : > { %p14_p5 = scmp.ge.s32.totalorder %s17_s11, 4   ;;  %s823_s7 = smov %s565_s8 }
  0xfd   : > { %s824_s8 = smov %s651_s20  ;;  %s825_s9 = smov %s573_s10 }
  0xfe   : > { %s826_s10 = smov %s828_s14  ;;  %16 = sbr.rel (!%p14_p5) target bundleno = 6 (0x6), region = 69 }
 0x103   :  { %320 = vsyncpa [#allocation3], 1 }
 0x104   :  { %322 = vsyncpa [#allocation3 + $0x1], 1 }
 0x105   :  { %323 = vsyncpa [#allocation4], 1 }
 0x106   :  { %325 = vsyncpa [#allocation4 + $0x1], 1 }

</bundles_post_ra>
